<compile_context>
chip_gen: v7x
topology: tpu7x:2x2x1
jax: 0.10.0
libtpu: 0.0.40
codegen_flags: <defaults>
</compile_context>

<pallas_src>
import jax
import jax.numpy as jnp
from jax.experimental import pallas as pl
from jax.experimental.pallas import tpu as pltpu


# ---------------------------------------------------------------------------
# Constant construction (pure wrapper glue, mirrors the PyTorch module init).
# ---------------------------------------------------------------------------
def pixel_coords(img_size: int) -> jax.Array:
    # torch.meshgrid default is 'ij' indexing.
    lin = jnp.linspace(-1.0, 1.0, img_size, dtype=jnp.float32)
    g1, g2 = jnp.meshgrid(lin, lin, indexing="ij")
    g1 = g1.reshape(1, 1, img_size, img_size)
    g2 = g2.reshape(1, 1, img_size, img_size)
    return jnp.concatenate((g1, g2), axis=1)  # (1, 2, H, W)


def make_uv(nout: int, img_size: int) -> jax.Array:
    coords = pixel_coords(img_size)
    zeros = jnp.zeros((1, nout - 2, img_size, img_size), dtype=jnp.float32)
    return jnp.concatenate((zeros, coords), axis=1)  # (1, nout, H, W)


# ---------------------------------------------------------------------------
# Kernel: one (batch, hw-tile) block of the fused SemiConv forward.
# ---------------------------------------------------------------------------
def _semiconv_kernel(gate_ref, w_ref, b_ref, x_ref, uv_ref, out_ref, delta_ref):
    # gate_ref: (1,) in SMEM         w_ref: (nout, nin)      b_ref: (nout, 1)
    # x_ref:  (1, nin,  hw_tile)     uv_ref: (1, nout, hw_tile)
    # out_ref:(1, nout, hw_tile)     delta_ref: (1, 2, hw_tile)
    gate = gate_ref[0]
    x = x_ref[0]                                   # (nin, hw_tile)
    w = w_ref[...]                                 # (nout, nin)
    nout = w.shape[0]

    # 1x1 conv over channels -> MXU matmul, f32 accumulation, then bias.
    y = jnp.dot(w, x, preferred_element_type=jnp.float32) + b_ref[...]
    g = gate * y                                   # gated conv output ("out" pre-uv)

    out_ref[0] = (g + uv_ref[0]).astype(out_ref.dtype)
    delta_ref[0] = g[nout - 2:, :].astype(delta_ref.dtype)


def _pick_hw_tile(hw: int, max_lanes: int = 8192) -> int:
    """Largest lane-dense tile (multiple of 128) dividing hw, capped for VMEM."""
    if hw <= max_lanes:
        return hw
    t = (max_lanes // 128) * 128
    while t >= 128:
        if hw % t == 0:
            return t
        t -= 128
    return hw  # fallback: single full-width block


# ---------------------------------------------------------------------------
# Wrapper: SemiConv.forward
# ---------------------------------------------------------------------------
def semiconv_forward(x, weight, bias, gate, uv):
    """x: (B, nin, H, W); weight: (nout, nin); bias: (nout,); gate: scalar;
    uv: (1, nout, H, W).  Returns (out + uv, delta) like the PyTorch module."""
    B, nin, H, W = x.shape
    nout = weight.shape[0]
    hw = H * W

    x_flat = x.reshape(B, nin, hw)
    uv_flat = uv.reshape(1, nout, hw)
    bias_col = bias.reshape(nout, 1).astype(jnp.float32)
    weight = weight.astype(jnp.float32)
    gate_arr = jnp.asarray(gate, dtype=jnp.float32).reshape(1)

    hw_tile = _pick_hw_tile(hw)
    grid = (B, hw // hw_tile)

    out_flat, delta_flat = pl.pallas_call(
        _semiconv_kernel,
        out_shape=(
            jax.ShapeDtypeStruct((B, nout, hw), x.dtype),
            jax.ShapeDtypeStruct((B, 2, hw), x.dtype),
        ),
        grid_spec=pltpu.PrefetchScalarGridSpec(
            num_scalar_prefetch=0,
            grid=grid,
            in_specs=[
                pl.BlockSpec(memory_space=pltpu.MemorySpace.SMEM),          # gate
                pl.BlockSpec((nout, nin), lambda b, j: (0, 0)),             # weight
                pl.BlockSpec((nout, 1), lambda b, j: (0, 0)),               # bias
                pl.BlockSpec((1, nin, hw_tile), lambda b, j: (b, 0, j)),    # x
                pl.BlockSpec((1, nout, hw_tile), lambda b, j: (0, 0, j)),   # uv
            ],
            out_specs=(
                pl.BlockSpec((1, nout, hw_tile), lambda b, j: (b, 0, j)),   # out + uv
                pl.BlockSpec((1, 2, hw_tile), lambda b, j: (b, 0, j)),      # delta
            ),
        ),
        compiler_params=pltpu.CompilerParams(
            dimension_semantics=("parallel", "parallel"),
        ),
    )(gate_arr, weight, bias_col, x_flat, uv_flat)

    out = out_flat.reshape(B, nout, H, W)
    delta = delta_flat.reshape(B, 2, H, W)
    return out, delta


# ---------------------------------------------------------------------------
# Self-test
# ---------------------------------------------------------------------------
if __name__ == "__main__":
    key = jax.random.PRNGKey(0)
    B, nin, nout, img_size = 2, 4, 8, 16

    k1, k2, k3 = jax.random.split(key, 3)
    x = jax.random.normal(k1, (B, nin, img_size, img_size), dtype=jnp.float32)
    weight = jax.random.normal(k2, (nout, nin), dtype=jnp.float32) * 0.1
    bias = jax.random.normal(k3, (nout,), dtype=jnp.float32) * 0.1
    # ScalarGate param (init is 0.0 in the module; use a nonzero value so the
    # conv path is actually exercised by the check).
    gate = jnp.asarray(0.5, dtype=jnp.float32)
    uv = make_uv(nout, img_size)

    out, delta = semiconv_forward(x, weight, bias, gate, uv)
    out = jax.block_until_ready(out)
    delta = jax.block_until_ready(delta)

    # Pure-JAX reference (same semantics as the PyTorch forward).
    y_ref = jnp.einsum("oc,bchw->bohw", weight, x) + bias.reshape(1, nout, 1, 1)
    g_ref = gate * y_ref
    ref_out = g_ref + uv
    ref_delta = g_ref[:, -2:, :, :]

    assert out.shape == (B, nout, img_size, img_size), out.shape
    assert delta.shape == (B, 2, img_size, img_size), delta.shape
    assert bool(jnp.allclose(out, ref_out, rtol=1e-5, atol=1e-5)), "out mismatch"
    assert bool(jnp.allclose(delta, ref_delta, rtol=1e-5, atol=1e-5)), "delta mismatch"

    print("KERNEL_OK")
</pallas_src>

<mosaic_0001>
module attributes {stable_mosaic.version = 11 : i64} {
  func.func @_semiconv_kernel(%arg0: i32, %arg1: i32, %arg2: memref<1xf32, #tpu.memory_space<smem>>, %arg3: memref<8x4xf32, #tpu.memory_space<vmem>>, %arg4: memref<8x1xf32, #tpu.memory_space<vmem>>, %arg5: memref<1x4x256xf32, #tpu.memory_space<vmem>>, %arg6: memref<1x8x256xf32, #tpu.memory_space<vmem>>, %arg7: memref<1x8x256xf32, #tpu.memory_space<vmem>>, %arg8: memref<1x2x256xf32, #tpu.memory_space<vmem>>) attributes {dimension_semantics = [#tpu.dimension_semantics<parallel>, #tpu.dimension_semantics<parallel>], iteration_bounds = array<i64: 2, 1>, scalar_prefetch = 0 : i64, scratch_operands = 0 : i64, tpu.core_type = #tpu.core_type<tc>, window_params = [{transform_indices = @transform_0, window_bounds = array<i64: 1>}, {pipeline_mode = #tpu.pipeline_mode<synchronous>, transform_indices = @transform_1, window_bounds = array<i64: 8, 4>}, {pipeline_mode = #tpu.pipeline_mode<synchronous>, transform_indices = @transform_2, window_bounds = array<i64: 8, 1>}, {transform_indices = @transform_3, window_bounds = array<i64: 1, 4, 256>}, {transform_indices = @transform_4, window_bounds = array<i64: 1, 8, 256>}, {transform_indices = @transform_5, window_bounds = array<i64: 1, 8, 256>}, {transform_indices = @transform_6, window_bounds = array<i64: 1, 2, 256>}]} {
    %c0 = arith.constant 0 : index
    %0 = memref.load %arg2[%c0] : memref<1xf32, #tpu.memory_space<smem>>
    %c0_0 = arith.constant 0 : index
    %c0_1 = arith.constant 0 : index
    %c0_2 = arith.constant 0 : index
    %1 = vector.load %arg5[%c0_0, %c0_1, %c0_2] : memref<1x4x256xf32, #tpu.memory_space<vmem>>, vector<1x4x256xf32>
    %2 = vector.shape_cast %1 : vector<1x4x256xf32> to vector<4x256xf32>
    %c0_3 = arith.constant 0 : index
    %c0_4 = arith.constant 0 : index
    %3 = vector.load %arg3[%c0_3, %c0_4] : memref<8x4xf32, #tpu.memory_space<vmem>>, vector<8x4xf32>
    %cst = arith.constant dense<0.000000e+00> : vector<8x256xf32>
    %4 = tpu.matmul %3, %2, %cst {dimension_numbers = #tpu.dot_dimension_numbers<[1], [0], [0], [1], [0, 0, 1, 1], [], []>} : vector<8x4xf32>, vector<4x256xf32>, vector<8x256xf32> -> vector<8x256xf32>
    %c0_5 = arith.constant 0 : index
    %c0_6 = arith.constant 0 : index
    %5 = vector.load %arg4[%c0_5, %c0_6] : memref<8x1xf32, #tpu.memory_space<vmem>>, vector<8x1xf32>
    %6 = vector.broadcast %5 : vector<8x1xf32> to vector<8x256xf32>
    %7 = arith.addf %4, %6 : vector<8x256xf32>
    %8 = vector.broadcast %0 : f32 to vector<8x256xf32>
    %9 = arith.mulf %8, %7 : vector<8x256xf32>
    %c0_7 = arith.constant 0 : index
    %c0_8 = arith.constant 0 : index
    %c0_9 = arith.constant 0 : index
    %10 = vector.load %arg6[%c0_7, %c0_8, %c0_9] : memref<1x8x256xf32, #tpu.memory_space<vmem>>, vector<1x8x256xf32>
    %11 = vector.shape_cast %10 : vector<1x8x256xf32> to vector<8x256xf32>
    %12 = arith.addf %9, %11 : vector<8x256xf32>
    %c0_10 = arith.constant 0 : index
    %c0_11 = arith.constant 0 : index
    %c0_12 = arith.constant 0 : index
    %13 = vector.load %arg7[%c0_10, %c0_11, %c0_12] : memref<1x8x256xf32, #tpu.memory_space<vmem>>, vector<1x8x256xf32>
    %14 = vector.shape_cast %13 : vector<1x8x256xf32> to vector<8x256xf32>
    %15 = vector.shape_cast %12 : vector<8x256xf32> to vector<1x8x256xf32>
    tpu.vector_store %arg7[%c0_10, %c0_11, %c0_12], %15 {strides = array<i32>} : memref<1x8x256xf32, #tpu.memory_space<vmem>>, vector<1x8x256xf32>,
    %16 = vector.extract_strided_slice %9 {offsets = [6, 0], sizes = [2, 256], strides = [1, 1]} : vector<8x256xf32> to vector<2x256xf32>
    %c0_13 = arith.constant 0 : index
    %c0_14 = arith.constant 0 : index
    %c0_15 = arith.constant 0 : index
    %17 = vector.load %arg8[%c0_13, %c0_14, %c0_15] : memref<1x2x256xf32, #tpu.memory_space<vmem>>, vector<1x2x256xf32>
    %18 = vector.shape_cast %17 : vector<1x2x256xf32> to vector<2x256xf32>
    %19 = vector.shape_cast %16 : vector<2x256xf32> to vector<1x2x256xf32>
    tpu.vector_store %arg8[%c0_13, %c0_14, %c0_15], %19 {strides = array<i32>} : memref<1x2x256xf32, #tpu.memory_space<vmem>>, vector<1x2x256xf32>,
    return
  }
  func.func @transform_0(%arg0: i32, %arg1: i32) -> i32 {
    %c0_i32 = arith.constant 0 : i32
    %c0_i32_0 = arith.constant 0 : i32
    return %c0_i32 : i32
  }
  func.func @transform_1(%arg0: i32, %arg1: i32) -> (i32, i32) {
    %c0_i32 = arith.constant 0 : i32
    %c0_i32_0 = arith.constant 0 : i32
    %c0_i32_1 = arith.constant 0 : i32
    return %c0_i32, %c0_i32_0 : i32, i32
  }
  func.func @transform_2(%arg0: i32, %arg1: i32) -> (i32, i32) {
    %c0_i32 = arith.constant 0 : i32
    %c0_i32_0 = arith.constant 0 : i32
    %c0_i32_1 = arith.constant 0 : i32
    return %c0_i32, %c0_i32_0 : i32, i32
  }
  func.func @transform_3(%arg0: i32, %arg1: i32) -> (i32, i32, i32) {
    %c0_i32 = arith.constant 0 : i32
    %c0_i32_0 = arith.constant 0 : i32
    return %arg0, %c0_i32, %arg1 : i32, i32, i32
  }
  func.func @transform_4(%arg0: i32, %arg1: i32) -> (i32, i32, i32) {
    %c0_i32 = arith.constant 0 : i32
    %c0_i32_0 = arith.constant 0 : i32
    %c0_i32_1 = arith.constant 0 : i32
    return %c0_i32, %c0_i32_0, %arg1 : i32, i32, i32
  }
  func.func @transform_5(%arg0: i32, %arg1: i32) -> (i32, i32, i32) {
    %c0_i32 = arith.constant 0 : i32
    %c0_i32_0 = arith.constant 0 : i32
    return %arg0, %c0_i32, %arg1 : i32, i32, i32
  }
  func.func @transform_6(%arg0: i32, %arg1: i32) -> (i32, i32, i32) {
    %c0_i32 = arith.constant 0 : i32
    %c0_i32_0 = arith.constant 0 : i32
    return %arg0, %c0_i32, %arg1 : i32, i32, i32
  }
}

</mosaic_0001>

<bundles_post_ra>
// kernel: tpu_custom_call.1
= control target key start
LH: loop header
LB: loop body
LE: loop exit
PB: predicated region body
PF: predicated region fallthrough
CT: control target
= control target key end

     0   :  { %s1006_s0 = inlined_call_operand.<no memory space> [shape: f32[1], index: 0, kind: input, shape index: {}]   ;;  %s1007_s1 = inlined_call_operand.vmem [shape: f32[8,4], index: 1, kind: input, shape index: {}]   ;;  %s1008_s2 = inlined_call_operand.vmem [shape: f32[8,1], index: 2, kind: input, shape index: {}]   ;;  %s1009_s3 = inlined_call_operand.vmem [shape: f32[2,4,256], index: 3, kind: input, shape index: {}]   ;;  %s1010_s4 = inlined_call_operand.vmem [shape: f32[1,8,256], index: 4, kind: input, shape index: {}]   ;;  %s1011_s5 = inlined_call_operand.hbm [shape: f32[2,8,256], index: 5, kind: output, shape index: {0}]   ;;  %s1012_s6 = inlined_call_operand.hbm [shape: f32[2,2,256], index: 6, kind: output, shape index: {1}]  }
   0x1   :  { %12 = sst [smem:[#allocation2]] %s1006_s0 }
   0x2   :  { %13 = vsyncpa [#allocation4], 0 }
   0x3   :  { %15 = vsyncpa [#allocation4 + $0x1], 0 }
   0x4   :  { %16 = vsyncpa [#allocation6], 0 }
   0x5   :  { %18 = vsyncpa [#allocation6 + $0x1], 0  ;;  %s839_s23 = smov 0   ;;  %s841_s24 = smov 0  }
   0x6   :  { %s843_s25 = smov 0   ;;  %s845_s26 = smov 0  }
   0x7   :  { %s847_s27 = smov 0   ;;  %s849_s28 = smov 0  }
   0x8 LB: > { %s595_s0 = sadd.s32 4294967295, %s794_s28   ;;  %s596_s29 = sadd.s32 4294967294, %s794_s28   ;;  %s794_s28 = sphi %s849_s28, %s24_s28   ;;  %s790_s27 = sphi %s847_s27, %s1019_s27   ;;  %s786_s26 = sphi %s845_s26, %s1018_s26   ;;  %s782_s25 = sphi %s843_s25, %s1017_s25   ;;  %s778_s24 = sphi %s841_s24, %s1016_s24   ;;  %s774_s23 = sphi %s839_s23, %s1015_s23  }
   0x9   : > { %s36_s30 = sadd.s32 1, %s790_s27  ;;  %s162_s7 = sadd.s32 1, %s782_s25 }
   0xa   : > { %p38_p0 = scmp.ge.s32.totalorder %s36_s30, 2  ;;  %p172_p1 = scmp.ne.s32.totalorder %s782_s25, %s778_s24 }
   0xb   : > { %p173_p2 = scmp.eq.s32.totalorder %s595_s0, 1  ;;  %p178_p3 = scmp.ne.s32.totalorder %s778_s24, %s774_s23 }
   0xc   : > { %s1021_s30 = smov (%p38_p0, %s36_s30), 0  ;;  %p179_p5 = scmp.eq.s32.totalorder %s596_s29, 1 }
   0xd   : > { %p879_p4 = por %p173_p2, %p172_p1  ;;  %s157_s9 = ssub.s32 %s790_s27, %s1021_s30 }
   0xe   : > { %p600_p6 = scmp.ge.s32.totalorder %s794_s28, 1  ;;  %p160_p7 = scmp.eq.s32.totalorder %s157_s9, 0 }
   0xf   : > { %p886_p8 = por %p179_p5, %p178_p3  ;;  %p256_p9 = scmp.lt.s32.totalorder %s794_s28, 3 }
  0x10   : > { %s892_s11 = scalar_select %p160_p7, %s782_s25, %s162_s7  }
  0x11   : > { %p257_p10 = pnand %p600_p6, %p256_p9 }
  0x12   : > { %p301_p11 = scmp.lt.s32.totalorder (!%p257_p10), %s786_s26, 1  ;;  %v796_v0 = vmov (!%p257_p10), 0.0   ;;  %v797_v1 = vmov (!%p257_p10), 0   ;;  %v321_v2 = vld [vmem:[%s1008_s2] sm:$0xff] (!%p257_p10)  ;;  %vm333_vm0 = vcmask (!%p257_p10), 1043456   ;;  %vm329_vm1 = vcmask (!%p257_p10), 31744  }
  0x13   : > { %260 = sbr.rel (%p257_p10) target bundleno = 291 (0x123), region = 40  ;;  %402 = vmatprep.mubr.f32.mxu0 (!%p257_p10), %v796_v0  ;;  %682 = vset.pattern.permute.xlu0 (!%p257_p10), %v797_v1  ;;  %v320_v5 = vld [vmem:[%s1007_s1] sm:$0xff] (!%p257_p10)  ;;  %s318_s21 = sld [smem:[#allocation2]] (!%p257_p10)  ;;  %v798_v6 = vmov (!%p257_p10), 1983009808   ;;  %v424_v8 = vlaneseq (!%p257_p10)  ;;  %v413_v19 = vld [vmem:[%s1010_s4 + $0x8] sm:$0xff] (!%p257_p10) }
  0x14   : > { %324 = vperm.xlu0 (!%p257_p10), %682, %v321_v2   ;;  %s906_s22 = sand.u32 (!%p257_p10), 1, %s778_s24   ;;  %v422_v7 = vunpack.c.l.s4 (!%p257_p10), %v798_v6  ;;  %v412_v16 = vld [vmem:[%s1010_s4] sm:$0xff] (!%p257_p10)  ;;  %s618_s20 = sshll.u32 (!%p257_p10), %s786_s26, 6 }
  0x15   : > { %s601_s0 = sshll.u32 (!%p257_p10), %s906_s22, 4  ;;  %v425_v13 = vshrl.u32 (!%p257_p10), %v424_v8, 7  ;;  %s602_s29 = sshll.u32 (!%p257_p10), %s906_s22, 2 }
  0x16   : > { %v423_v12 = vunpack.c.0.s8 (!%p257_p10), %v422_v7  ;;  %s432_s7 = scalar_lea.sflag (!%p257_p10), [#allocation4], %s906_s22  ;;  %s799_s12 = smov (!%p257_p10), [#allocation3]  }
  0x17   : > { %s688_s13 = sshll.u32 (!%p257_p10), %s799_s12, 4  ;;  %s689_s13 = int_to_ptr.vmem [resolvable:$false] %s688_s13 }
  0x18   : > { %v426_v21 = vsub.s32 (!%p257_p10), %v423_v12, %v425_v13 }
  0x19   : > { %v409_v11 = vstv (!%p257_p10), %s318_s21  ;;  %s925_s21 = scalar_lea.vmem (!%p257_p10), [#allocation5], %s602_s29 }
  0x1a   : > { %s302_s14 = scalar_select %p301_p11, %s786_s26, 1 }
  0x1c   : > { %s616_s15 = sshll.u32 %s302_s14, 3  ;;  %s617_s14 = sshll.u32 %s786_s26, 8 }
  0x1d   : > { %s308_s18 = scalar_lea.vmem %s1009_s3, %s616_s15  ;;  %s292_s15 = scalar_lea.vmem [#allocation3], %s601_s0 }
  0x1e   : > { %v319_v3 = vld [vmem:[%s308_s18] sm:$0xff]  ;;  %s453_s16 = sshll.u32 %s292_s15, 4  ;;  %s920_s19 = scalar_lea.hbm %s1011_s5, %s617_s14  ;;  %s922_s16 = int_to_ptr.vmem [resolvable:$true] %s453_s16 }
  0x1f   : > { %v328_v4 = vcombine.high %v319_v3, %v319_v3  ;;  %s469_s0 = sshll.u32 %s925_s21, 4  ;;  %s684_s9 = scalar_lea.vmem %s922_s16, 256  ;;  %s959_s0 = int_to_ptr.vmem [resolvable:$true] %s469_s0 }
  0x20   : > { %p685_p12 = scmp.ne.s32.totalorder %s922_s16, %s684_s9  ;;  %s690_s14 = scalar_lea.vmem %s689_s13, 512 }
  0x21   : > { %605 = vmatprep.subr.msk.mxu0 %vm333_vm0, %v328_v4  ;;  %p691_p1 = scmp.lt.s32.totalorder %s922_s16, %s689_s13  ;;  %p692_p2 = scmp.lt.s32.totalorder %s690_s14, %s684_s9 }
  0x22   : > { %606 = vmatpush1.msk.msra.mxu0 %vm333_vm0, %v319_v3  ;;  %p686_p13 = pnand %p685_p12, %p879_p4 }
  0x23   : > { %607 = vmatmul.mubr.msk.f32.vlgmr.msra.gmra.mrb[0].mxu0 %vm329_vm1, %v320_v5  ;;  %p693_p3 = por %p692_p2, %p691_p1 }
  0x24   : > { %p687_p0 = pneg %p686_p13 }
  0x26   : > { %p694_p5 = pnand %p693_p3, %p687_p0 }
  0x93   : > { %v325_v9 = vpop.permute.xlu0 %324 }
  0xf6   : > { %v404_v10 = vpop.f32.mrb[0].mxu0 }
  0xf7   : > { %v405_v14 = vadd.f32 %v404_v10, %v325_v9  ;;  %v406_v15 = vpop.f32.mrb[1].mxu0 }
  0xf8   : > { %v407_v17 = vadd.f32 %v406_v15, %v325_v9 }
  0xf9   : > { %v410_v18 = vmul.f32 %v409_v11, %v405_v14 }
  0xfa   : > { %v411_v20 = vmul.f32 %v409_v11, %v407_v17 }
  0xfb   : > { %v414_v22 = vadd.f32 %v412_v16, %v410_v18 }
  0xfc   : > { %v415_v23 = vadd.f32 %v413_v19, %v411_v20  ;;  %v420_v24 = vcombine.high %v410_v18, %v411_v20 }
  0xfd   : > { %416 = vst [vmem:[%s292_s15] sm:$0xff] %v414_v22 }
  0xfe   : > { %417 = vst [vmem:[%s292_s15 + $0x8] sm:$0xff] %v415_v23  ;;  %v427_v25 = vrot.slane %v420_v24, %v426_v21 }
  0xff   : > { %697 = shalt.err (!%p694_p5)
}
 0x100   : > { %s698_s29 = scalar_lea.hbm %s920_s19, 256  ;;  %s702_s18 = scalar_lea.hbm %s1011_s5, 512 }
 0x101   : > { %p699_p6 = scmp.ne.s32.totalorder %s920_s19, %s698_s29  ;;  %p703_p10 = scmp.lt.u32.totalorder %s920_s19, %s1011_s5 }
 0x102   : > { %p704_p11 = scmp.lt.u32.totalorder %s702_s18, %s698_s29  ;;  %p706_p13 = scmp.lt.u32.totalorder %s698_s29, %s920_s19 }
 0x103   : > { %p700_p7 = pnand %p699_p6, %p879_p4 }
 0x104   : > { %p705_p12 = por %p704_p11, %p703_p10 }
 0x105   : > { %p701_p9 = pneg %p700_p7 }
 0x106   : > { %p707_p0 = por %p706_p13, %p705_p12 }
 0x108   : > { %p708_p1 = pnand %p707_p0, %p701_p9 }
 0x10a   : > { %711 = shalt.err (!%p708_p1)
}
 0x10b   : > { %619 = dma.vmem_to_hbm [thread:$0]  (%p879_p4), %s922_s16, 256, %s920_s19, %s432_s7   ;;  %v428_v26 = vcombine.high %v427_v25, %v427_v25 }
 0x10c   : > { %s955_s15 = scalar_lea.hbm %s1012_s6, %s618_s20  ;;  %s437_s29 = scalar_lea.sflag [#allocation6], %s906_s22 }
 0x10d   : > { %430 = vst [vmem:[%s925_s21] sm:$0xf] %v428_v26  ;;  %s712_s17 = scalar_lea.vmem %s959_s0, 64  ;;  %s800_s16 = smov [#allocation5]  }
 0x10e   : > { %p713_p2 = scmp.ne.s32.totalorder %s959_s0, %s712_s17  ;;  %s716_s26 = sshll.u32 %s800_s16, 4  ;;  %s717_s26 = int_to_ptr.vmem [resolvable:$false] %s716_s26 }
 0x10f   : > { %s718_s19 = scalar_lea.vmem %s717_s26, 128  ;;  %p719_p6 = scmp.lt.s32.totalorder %s959_s0, %s717_s26 }
 0x110   : > { %p714_p3 = pnand %p713_p2, %p879_p4  ;;  %p720_p7 = scmp.lt.s32.totalorder %s718_s19, %s712_s17 }
 0x112   : > { %p715_p5 = pneg %p714_p3  ;;  %p721_p9 = por %p720_p7, %p719_p6 }
 0x114   : > { %p722_p10 = pnand %p721_p9, %p715_p5 }
 0x116   : > { %725 = shalt.err (!%p722_p10)
}
 0x117   : > { %s726_s22 = scalar_lea.hbm %s955_s15, 64  ;;  %s730_s7 = scalar_lea.hbm %s1012_s6, 128 }
 0x118   : > { %p727_p11 = scmp.ne.s32.totalorder %s955_s15, %s726_s22  ;;  %p731_p0 = scmp.lt.u32.totalorder %s955_s15, %s1012_s6 }
 0x119   : > { %p732_p1 = scmp.lt.u32.totalorder %s730_s7, %s726_s22  ;;  %p734_p3 = scmp.lt.u32.totalorder %s726_s22, %s955_s15 }
 0x11a   : > { %p728_p12 = pnand %p727_p11, %p879_p4 }
 0x11b   : > { %p733_p2 = por %p732_p1, %p731_p0 }
 0x11c   : > { %p729_p13 = pneg %p728_p12 }
 0x11d   : > { %p735_p5 = por %p734_p3, %p733_p2 }
 0x11f   : > { %p736_p6 = pnand %p735_p5, %p729_p13 }
 0x121   : > { %739 = shalt.err (!%p736_p6)
}
 0x122   : > { %620 = dma.vmem_to_hbm [thread:$0]  (%p879_p4), %s959_s0, 64, %s955_s15, %s437_s29  }
 0x123 PF: > { %p630_p7 = scmp.ge.s32.totalorder %s794_s28, 2  ;;  %s481_s13 = sand.u32 1, %s774_s23  }
 0x124   : > { %s482_s9 = scalar_lea.sflag [#allocation4], %s481_s13 }
 0x125   : > { %p624_p9 = pnand %p630_p7, %p886_p8 }
 0x127   : > { %765 = dma.done.wait (!%p624_p9), %s482_s9, 256  }
 0x128   : > { %767 = vsyncadd (!%p624_p9), %s482_s9, 4294967040  ;;  %s491_s14 = scalar_lea.sflag [#allocation6], %s481_s13 }
 0x129   : > { %769 = dma.done.wait (!%p624_p9), %s491_s14, 64  }
 0x12a   : > { %771 = vsyncadd (!%p624_p9), %s491_s14, 4294967232  ;;  %s24_s28 = sadd.s32 1, %s794_s28   ;;  %s1015_s23 = smov %s778_s24 }
 0x12b   : > { %p21_p10 = scmp.ge.s32.totalorder %s24_s28, 4   ;;  %s1016_s24 = smov %s782_s25 }
 0x12c   : > { %s1017_s25 = smov %s892_s11  ;;  %s1018_s26 = smov %s790_s27 }
 0x12d   : > { %s1019_s27 = smov %s1021_s30  ;;  %23 = sbr.rel (!%p21_p10) target bundleno = 8 (0x8), region = 95 }
 0x134   :  { %496 = vsyncpa [#allocation4], 1 }
 0x135   :  { %498 = vsyncpa [#allocation4 + $0x1], 1 }
 0x136   :  { %499 = vsyncpa [#allocation6], 1 }
 0x137   :  { %501 = vsyncpa [#allocation6 + $0x1], 1 }

</bundles_post_ra>
